<compile_context>
chip_gen: v5e
topology: v5e:2x2
jax: 0.10.0
libtpu: 0.0.40
codegen_flags: <defaults>
</compile_context>

<pallas_src>
import jax
import jax.numpy as jnp
from jax.experimental import pallas as pl
from jax.experimental.pallas import tpu as pltpu


def _round_up(x, m):
    return ((x + m - 1) // m) * m


def _mxu_k_align():
    # v6e / v7x MXUs are 2x256x256 -> pad the matmul K dim to 256; older chips
    # (128x128 MXU) are fully fed at 128 and the smaller K is cheaper there.
    try:
        kind = jax.devices()[0].device_kind.lower()
        if "v6" in kind or "v7" in kind:
            return 256
    except Exception:
        pass
    return 128


def _embed_kernel(tok_ref, pos_ref, table_ref, o_ref):
    # tok_ref:   (tile, 1)   int32 token ids
    # pos_ref:   (tile, H)   f32 positional slab block
    # table_ref: (V_pad, H)  bf16 word-embedding table (VMEM resident, constant)
    # o_ref:     (tile, H)   out_dtype
    tile = tok_ref.shape[0]
    v_pad = table_ref.shape[0]
    col = jax.lax.broadcasted_iota(jnp.int32, (tile, v_pad), 1)
    onehot = (col == tok_ref[...]).astype(table_ref.dtype)      # 1 compare + cast
    # Gather as a single MXU pass (bf16 x bf16, f32 accumulation -> exact gather).
    emb = jnp.dot(onehot, table_ref[...], preferred_element_type=jnp.float32)
    o_ref[...] = (emb + pos_ref[...]).astype(o_ref.dtype)


def prepare_reformer_embedding_params(word_emb, axial_w0, axial_w1, *,
                                      table_dtype=jnp.bfloat16):
    """One-time (weight-load time) preprocessing, hoisted out of the fwd path.

    word_emb: (V, H) f32; axial_w0: (ax0, 1, d0); axial_w1: (1, ax1, d1).
    Returns (word_table (V_pad, H) table_dtype, pos_full (ax0*ax1, H) f32).
    """
    V, H = word_emb.shape
    ax0, _, d0 = axial_w0.shape
    _, ax1, d1 = axial_w1.shape
    if d0 + d1 != H:
        raise ValueError("axial_pos_embds_dim must sum to hidden_size")

    v_pad = _round_up(V, _mxu_k_align())
    word_table = jnp.zeros((v_pad, H), word_emb.dtype).at[:V].set(word_emb)
    word_table = word_table.astype(table_dtype)

    # Flattened axial grid (eval path): pos_full[s] = concat(w0[s//ax1], w1[s%ax1]).
    grid = jnp.concatenate(
        [jnp.broadcast_to(axial_w0, (ax0, ax1, d0)),
         jnp.broadcast_to(axial_w1, (ax0, ax1, d1))], axis=-1)
    pos_full = grid.reshape(ax0 * ax1, H).astype(jnp.float32)
    return word_table, pos_full


def reformer_embeddings_fwd(input_ids, word_table, pos_full, *,
                            row_tile=512, out_dtype=jnp.bfloat16):
    """Eval-mode ReformerEmbeddings forward (input_ids path, default position_ids).

    input_ids:  (B, S) int32
    word_table: (V_pad, H) bf16   from prepare_reformer_embedding_params
    pos_full:   (ax0*ax1, H) f32  from prepare_reformer_embedding_params
    Returns (B, S, H) in out_dtype.
    """
    B, S = input_ids.shape
    v_pad, H = word_table.shape
    P = pos_full.shape[0]
    if P < S:
        raise ValueError("axial_pos_shape must multiply to at least seq_length")

    # Tile along the sequence of each batch row, so the positional slab block
    # index is simply (i % n_s_tiles).  512 rows/step amortizes per-step
    # overhead; clamp for tiny demo shapes (keep a multiple of 8 sublanes).
    tile = min(row_tile, _round_up(S, 8))
    tile = max(8, _round_up(tile, 8))
    n_s_tiles = pl.cdiv(S, tile)
    s_pad = n_s_tiles * tile
    n_tiles = B * n_s_tiles

    ids = jnp.pad(input_ids.astype(jnp.int32), ((0, 0), (0, s_pad - S)))
    ids_col = ids.reshape(B * s_pad, 1)                       # one small DMA / step
    pos_pad = jnp.pad(pos_full[:S], ((0, s_pad - S), (0, 0))) # (s_pad, H) f32

    def call(table_spec):
        return pl.pallas_call(
            _embed_kernel,
            out_shape=jax.ShapeDtypeStruct((B * s_pad, H), out_dtype),
            grid_spec=pltpu.PrefetchScalarGridSpec(
                num_scalar_prefetch=0,
                grid=(n_tiles,),
                in_specs=[
                    pl.BlockSpec((tile, 1), lambda i: (i, 0)),             # token ids
                    pl.BlockSpec((tile, H), lambda i: (i % n_s_tiles, 0)), # pos slab
                    table_spec,                                            # word table
                ],
                out_specs=pl.BlockSpec((tile, H), lambda i: (i, 0)),
            ),
            compiler_params=pltpu.CompilerParams(
                # Independent row tiles -> megacore / 2-TC sharding on v7x.
                dimension_semantics=("parallel",)),
        )(ids_col, pos_pad, word_table)

    try:
        # Constant-index table: single VMEM buffer, no redundant per-step refetch.
        out = call(pl.BlockSpec((v_pad, H), lambda i: (0, 0),
                                pipeline_mode=pl.Buffered(1)))
    except Exception:
        out = call(pl.BlockSpec((v_pad, H), lambda i: (0, 0)))

    return out.reshape(B, s_pad, H)[:, :S]


def reference(input_ids, word_emb, axial_w0, axial_w1):
    """Pure-JAX f32 reference matching the PyTorch module in eval mode."""
    ax0, _, d0 = axial_w0.shape
    _, ax1, d1 = axial_w1.shape
    S = input_ids.shape[1]
    tok = word_emb[input_ids]                                        # (B, S, H)
    grid = jnp.concatenate(
        [jnp.broadcast_to(axial_w0, (ax0, ax1, d0)),
         jnp.broadcast_to(axial_w1, (ax0, ax1, d1))], axis=-1)       # (ax0, ax1, H)
    pos = grid.reshape(ax0 * ax1, d0 + d1)[:S][None]                 # (1, S, H)
    return tok + pos


if __name__ == "__main__":
    # Small config consistent with ReformerEmbeddings + axial position embeddings:
    # hidden_size=128, axial_pos_embds_dim=(64, 64), axial_pos_shape=(8, 8).
    B, S = 2, 16
    V, H = 96, 128
    ax_shape = (8, 8)
    ax_dims = (64, 64)

    key = jax.random.PRNGKey(0)
    k_ids, k_emb, k_w0, k_w1 = jax.random.split(key, 4)

    input_ids = jax.random.randint(k_ids, (B, S), 0, V, dtype=jnp.int32)
    word_emb = 0.02 * jax.random.normal(k_emb, (V, H), dtype=jnp.float32)
    # Module stores axial weights as (ax0, 1, d0) and (1, ax1, d1).
    axial_w0 = jax.random.normal(k_w0, (ax_shape[0], 1, ax_dims[0]), dtype=jnp.float32)
    axial_w1 = jax.random.normal(k_w1, (1, ax_shape[1], ax_dims[1]), dtype=jnp.float32)

    # One-time weight preprocessing (hoisted out of the per-call path).
    word_table, pos_full = prepare_reformer_embedding_params(word_emb, axial_w0, axial_w1)

    # f32 output: gather is exact modulo bf16 rounding of the stored word_emb,
    # positional add is done in f32.
    out_f32 = jax.block_until_ready(
        reformer_embeddings_fwd(input_ids, word_table, pos_full,
                                out_dtype=jnp.float32))
    # Default bf16 output (halves HBM write traffic).
    out_bf16 = jax.block_until_ready(
        reformer_embeddings_fwd(input_ids, word_table, pos_full))

    bf = lambda a: a.astype(jnp.bfloat16).astype(jnp.float32)
    ref_bf_words = reference(input_ids, bf(word_emb), axial_w0, axial_w1)
    ref_f32 = reference(input_ids, word_emb, axial_w0, axial_w1)

    assert out_f32.shape == (B, S, H)
    assert out_bf16.shape == (B, S, H)
    # Exact check of kernel logic (word_emb rounded to bf16, everything else f32).
    assert jnp.allclose(out_f32, ref_bf_words, atol=1e-6, rtol=1e-6)
    # Loose checks against the pure-f32 module semantics.
    assert jnp.allclose(out_f32, ref_f32, atol=2e-2, rtol=2e-2)
    assert jnp.allclose(out_bf16.astype(jnp.float32), ref_f32, atol=5e-2, rtol=5e-2)

    print("KERNEL_OK")
</pallas_src>

<mosaic_0001>
module attributes {stable_mosaic.version = 11 : i64} {
  func.func @_embed_kernel(%arg0: i32, %arg1: memref<16x1xi32, #tpu.memory_space<vmem>>, %arg2: memref<16x128xf32, #tpu.memory_space<vmem>>, %arg3: memref<128x128xbf16, #tpu.memory_space<vmem>>, %arg4: memref<16x128xf32, #tpu.memory_space<vmem>>) attributes {dimension_semantics = [#tpu.dimension_semantics<parallel>], iteration_bounds = array<i64: 2>, scalar_prefetch = 0 : i64, scratch_operands = 0 : i64, tpu.core_type = #tpu.core_type<tc>, window_params = [{transform_indices = @transform_0, window_bounds = array<i64: 16, 1>}, {transform_indices = @transform_1, window_bounds = array<i64: 16, 128>}, {pipeline_mode = #tpu.pipeline_mode<synchronous>, transform_indices = @transform_2, window_bounds = array<i64: 128, 128>}, {transform_indices = @transform_3, window_bounds = array<i64: 16, 128>}]} {
    %0 = tpu.iota {dimensions = array<i32: 1>} : vector<16x128xi32>
    %c0 = arith.constant 0 : index
    %c0_0 = arith.constant 0 : index
    %1 = vector.load %arg1[%c0, %c0_0] : memref<16x1xi32, #tpu.memory_space<vmem>>, vector<16x1xi32>
    %2 = vector.broadcast %1 : vector<16x1xi32> to vector<16x128xi32>
    %3 = arith.cmpi eq, %0, %2 : vector<16x128xi32>
    %4 = arith.extui %3 : vector<16x128xi1> to vector<16x128xi32>
    %5 = arith.sitofp %4 : vector<16x128xi32> to vector<16x128xf32>
    %6 = arith.truncf %5 : vector<16x128xf32> to vector<16x128xbf16>
    %c0_1 = arith.constant 0 : index
    %c0_2 = arith.constant 0 : index
    %7 = vector.load %arg3[%c0_1, %c0_2] : memref<128x128xbf16, #tpu.memory_space<vmem>>, vector<128x128xbf16>
    %cst = arith.constant dense<0.000000e+00> : vector<16x128xf32>
    %8 = tpu.matmul %6, %7, %cst {dimension_numbers = #tpu.dot_dimension_numbers<[1], [0], [0], [1], [0, 0, 1, 1], [], []>} : vector<16x128xbf16>, vector<128x128xbf16>, vector<16x128xf32> -> vector<16x128xf32>
    %c0_3 = arith.constant 0 : index
    %c0_4 = arith.constant 0 : index
    %9 = vector.load %arg2[%c0_3, %c0_4] : memref<16x128xf32, #tpu.memory_space<vmem>>, vector<16x128xf32>
    %10 = arith.addf %8, %9 : vector<16x128xf32>
    %c0_5 = arith.constant 0 : index
    %c0_6 = arith.constant 0 : index
    %11 = vector.load %arg4[%c0_5, %c0_6] : memref<16x128xf32, #tpu.memory_space<vmem>>, vector<16x128xf32>
    tpu.vector_store %arg4[%c0_5, %c0_6], %10 {strides = array<i32>} : memref<16x128xf32, #tpu.memory_space<vmem>>, vector<16x128xf32>,
    return
  }
  func.func @transform_0(%arg0: i32) -> (i32, i32) {
    %c0_i32 = arith.constant 0 : i32
    %c0_i32_0 = arith.constant 0 : i32
    return %arg0, %c0_i32 : i32, i32
  }
  func.func @transform_1(%arg0: i32) -> (i32, i32) {
    %c1_i32 = arith.constant 1 : i32
    %c0_i32 = arith.constant 0 : i32
    %0 = arith.cmpi eq, %c1_i32, %c0_i32 : i32
    %c1_i32_0 = arith.constant 1 : i32
    %1 = arith.select %0, %c1_i32_0, %c1_i32 : i32
    %2 = arith.remsi %arg0, %1 : i32
    %c0_i32_1 = arith.constant 0 : i32
    %3 = arith.cmpi ne, %2, %c0_i32_1 : i32
    %c0_i32_2 = arith.constant 0 : i32
    %4 = arith.cmpi slt, %2, %c0_i32_2 : i32
    %c0_i32_3 = arith.constant 0 : i32
    %5 = arith.cmpi slt, %1, %c0_i32_3 : i32
    %6 = arith.xori %4, %5 : i1
    %7 = arith.andi %6, %3 : i1
    %8 = arith.addi %2, %1 : i32
    %9 = arith.select %7, %8, %2 : i32
    %c0_i32_4 = arith.constant 0 : i32
    %c0_i32_5 = arith.constant 0 : i32
    return %9, %c0_i32_4 : i32, i32
  }
  func.func @transform_2(%arg0: i32) -> (i32, i32) {
    %c0_i32 = arith.constant 0 : i32
    %c0_i32_0 = arith.constant 0 : i32
    %c0_i32_1 = arith.constant 0 : i32
    return %c0_i32, %c0_i32_0 : i32, i32
  }
  func.func @transform_3(%arg0: i32) -> (i32, i32) {
    %c0_i32 = arith.constant 0 : i32
    %c0_i32_0 = arith.constant 0 : i32
    return %arg0, %c0_i32 : i32, i32
  }
}

module attributes {stable_mosaic.version = 11 : i64} {
  func.func @_embed_kernel(%arg0: i32, %arg1: memref<16x1xi32, #tpu.memory_space<vmem>>, %arg2: memref<16x128xf32, #tpu.memory_space<vmem>>, %arg3: memref<128x128xbf16, #tpu.memory_space<vmem>>, %arg4: memref<16x128xf32, #tpu.memory_space<vmem>>) attributes {dimension_semantics = [#tpu.dimension_semantics<parallel>], iteration_bounds = array<i64: 2>, scalar_prefetch = 0 : i64, scratch_operands = 0 : i64, tpu.core_type = #tpu.core_type<tc>, window_params = [{transform_indices = @transform_0, window_bounds = array<i64: 16, 1>}, {transform_indices = @transform_1, window_bounds = array<i64: 16, 128>}, {pipeline_mode = #tpu.pipeline_mode<synchronous>, transform_indices = @transform_2, window_bounds = array<i64: 128, 128>}, {transform_indices = @transform_3, window_bounds = array<i64: 16, 128>}]} {
    %0 = tpu.iota {dimensions = array<i32: 1>} : vector<16x128xi32>
    %c0 = arith.constant 0 : index
    %c0_0 = arith.constant 0 : index
    %1 = vector.load %arg1[%c0, %c0_0] : memref<16x1xi32, #tpu.memory_space<vmem>>, vector<16x1xi32>
    %2 = vector.broadcast %1 : vector<16x1xi32> to vector<16x128xi32>
    %3 = arith.cmpi eq, %0, %2 : vector<16x128xi32>
    %4 = arith.extui %3 : vector<16x128xi1> to vector<16x128xi32>
    %5 = arith.sitofp %4 : vector<16x128xi32> to vector<16x128xf32>
    %6 = arith.truncf %5 : vector<16x128xf32> to vector<16x128xbf16>
    %c0_1 = arith.constant 0 : index
    %c0_2 = arith.constant 0 : index
    %7 = vector.load %arg3[%c0_1, %c0_2] : memref<128x128xbf16, #tpu.memory_space<vmem>>, vector<128x128xbf16>
    %cst = arith.constant dense<0.000000e+00> : vector<16x128xf32>
    %8 = tpu.matmul %6, %7, %cst {dimension_numbers = #tpu.dot_dimension_numbers<[1], [0], [0], [1], [0, 0, 1, 1], [], []>} : vector<16x128xbf16>, vector<128x128xbf16>, vector<16x128xf32> -> vector<16x128xf32>
    %c0_3 = arith.constant 0 : index
    %c0_4 = arith.constant 0 : index
    %9 = vector.load %arg2[%c0_3, %c0_4] : memref<16x128xf32, #tpu.memory_space<vmem>>, vector<16x128xf32>
    %10 = arith.addf %8, %9 : vector<16x128xf32>
    %c0_5 = arith.constant 0 : index
    %c0_6 = arith.constant 0 : index
    %11 = vector.load %arg4[%c0_5, %c0_6] : memref<16x128xf32, #tpu.memory_space<vmem>>, vector<16x128xf32>
    tpu.vector_store %arg4[%c0_5, %c0_6], %10 {strides = array<i32>} : memref<16x128xf32, #tpu.memory_space<vmem>>, vector<16x128xf32>,
    return
  }
  func.func @transform_0(%arg0: i32) -> (i32, i32) {
    %c0_i32 = arith.constant 0 : i32
    %c0_i32_0 = arith.constant 0 : i32
    return %arg0, %c0_i32 : i32, i32
  }
  func.func @transform_1(%arg0: i32) -> (i32, i32) {
    %c1_i32 = arith.constant 1 : i32
    %c0_i32 = arith.constant 0 : i32
    %0 = arith.cmpi eq, %c1_i32, %c0_i32 : i32
    %c1_i32_0 = arith.constant 1 : i32
    %1 = arith.select %0, %c1_i32_0, %c1_i32 : i32
    %2 = arith.remsi %arg0, %1 : i32
    %c0_i32_1 = arith.constant 0 : i32
    %3 = arith.cmpi ne, %2, %c0_i32_1 : i32
    %c0_i32_2 = arith.constant 0 : i32
    %4 = arith.cmpi slt, %2, %c0_i32_2 : i32
    %c0_i32_3 = arith.constant 0 : i32
    %5 = arith.cmpi slt, %1, %c0_i32_3 : i32
    %6 = arith.xori %4, %5 : i1
    %7 = arith.andi %6, %3 : i1
    %8 = arith.addi %2, %1 : i32
    %9 = arith.select %7, %8, %2 : i32
    %c0_i32_4 = arith.constant 0 : i32
    %c0_i32_5 = arith.constant 0 : i32
    return %9, %c0_i32_4 : i32, i32
  }
  func.func @transform_2(%arg0: i32) -> (i32, i32) {
    %c0_i32 = arith.constant 0 : i32
    %c0_i32_0 = arith.constant 0 : i32
    %c0_i32_1 = arith.constant 0 : i32
    return %c0_i32, %c0_i32_0 : i32, i32
  }
  func.func @transform_3(%arg0: i32) -> (i32, i32) {
    %c0_i32 = arith.constant 0 : i32
    %c0_i32_0 = arith.constant 0 : i32
    return %arg0, %c0_i32 : i32, i32
  }
}

</mosaic_0001>

<bundles_post_ra>
// kernel: tpu_custom_call.1
= control target key start
LH: loop header
LB: loop body
LE: loop exit
PB: predicated region body
PF: predicated region fallthrough
CT: control target
= control target key end

     0   :  { %8 = vsyncpa [#allocation3], 0  ;;  %s719_s0 = inlined_call_operand.vmem [shape: s32[32,1], index: 0, kind: input, shape index: {}]   ;;  %s720_s1 = inlined_call_operand.vmem [shape: f32[16,128], index: 1, kind: input, shape index: {}]   ;;  %s721_s2 = inlined_call_operand.hbm [shape: bf16[128,128], index: 2, kind: input, shape index: {}]   ;;  %s722_s3 = inlined_call_operand.hbm [shape: f32[32,128], index: 3, kind: output, shape index: {}]  }
   0x1   :  { %9 = vsyncpa [#allocation4], 0 }
   0x2   :  { %11 = vsyncpa [#allocation4 + $0x1], 0  ;;  %s619_s12 = smov 0   ;;  %s621_s13 = smov 0  }
   0x3   :  { %s623_s14 = smov 0   ;;  %s625_s15 = smov 0  }
   0x4 LB: > { %s640_s16 = sadd.s32 4294967295, %s590_s15   ;;  %s378_s17 = sadd.s32 4294967294, %s590_s15   ;;  %s590_s15 = sphi %s625_s15, %s728_s15   ;;  %s586_s14 = sphi %s623_s14, %s727_s14   ;;  %s582_s13 = sphi %s621_s13, %s726_s13   ;;  %s578_s12 = sphi %s619_s12, %s725_s12  }
   0x5   : > { %s644_s18 = sadd.s32 1, %s590_s15   ;;  %s92_s19 = sadd.s32 1, %s586_s14 }
   0x6   : > { %s89_s20 = ssub.s32 %s590_s15, %s644_s18  ;;  %p102_p0 = scmp.ne.s32.totalorder %s586_s14, %s582_s13 }
   0x7   : > { %p90_p1 = scmp.eq.s32.totalorder %s89_s20, 0  ;;  %p103_p2 = scmp.eq.s32.totalorder %s640_s16, 1 }
   0x8   : > { %p108_p3 = scmp.ne.s32.totalorder %s582_s13, %s578_s12  ;;  %p109_p4 = scmp.eq.s32.totalorder %s378_s17, 1 }
   0x9   : > { %s655_s21 = scalar_select %p90_p1, %s586_s14, %s92_s19  }
   0xa   : > { %p657_p5 = por %p103_p2, %p102_p0  ;;  %p661_p6 = por %p109_p4, %p108_p3 }
   0xb   : > { %p379_p7 = scmp.ge.s32.totalorder %s590_s15, 1  ;;  %p116_p8 = scmp.lt.s32.totalorder %s590_s15, 3 }
   0xc   : > { %p451_p9 = scmp.eq.s32.totalorder %s640_s16, 0  ;;  %s130_s26 = sshll.u32 %s721_s2, 4  ;;  %s131_s26 = int_to_ptr.hbm [resolvable:$true] %s130_s26 }
   0xd   : > { %p117_p10 = pnand %p379_p7, %p116_p8  ;;  %s592_s27 = smov [#allocation2]  }
   0xe   : > { %s132_s28 = sshll.u32 %s592_s27, 4  ;;  %s593_s29 = smov 64   ;;  %s133_s28 = int_to_ptr.vmem [resolvable:$true] %s132_s28 }
   0xf   : > { %p443_p11 = pneg %p117_p10  ;;  %s594_s30 = smov 4  }
  0x10   : > { %157 = sbr.rel (%p117_p10) target bundleno = 294 (0x126), region = 32 }
  0x11   : > { %p444_p12 = pnand %p451_p9, %p443_p11 }
  0x13   : > { %446 = dma.hbm_to_vmem [thread:$0]  (!%p444_p12), %s131_s26, 1024, %s133_s28, [#allocation3], %s593_s29, %s593_s29, %s594_s30  }
  0x15   : > { %569 = dma.done.wait (%p451_p9), [#allocation3], 1024  }
  0x16   : > { %571 = vsyncadd (%p451_p9), [#allocation3], 4294966272  ;;  %s385_s4 = sshll.u32 %s640_s16, 1  ;;  %v595_v0 = vmov 0   ;;  %v435_v2 = vld [vmem:[#allocation2 + $0x38] sm:$0xff]  ;;  %v434_v3 = vld [vmem:[#allocation2 + $0x30] sm:$0xff]  ;;  %v189_v12 = vlaneseq }
  0x17   : > { %493 = vset.pattern.permute.xlu0 %v595_v0  ;;  %p183_p13 = scmp.lt.s32.totalorder %s385_s4, 3  ;;  %272 = vmatpush.bf16.msra.mxu0 %v435_v2  ;;  %v433_v5 = vld [vmem:[#allocation2 + $0x28] sm:$0xff]  ;;  %v432_v6 = vld [vmem:[#allocation2 + $0x20] sm:$0xff]  ;;  %v431_v7 = vld [vmem:[#allocation2 + $0x18] sm:$0xff]  ;;  %v596_v15 = vmov 1.0|1.0  }
  0x18   : > { %v430_v8 = vld [vmem:[#allocation2 + $0x10] sm:$0xff]  ;;  %v429_v9 = vld [vmem:[#allocation2 + $0x8] sm:$0xff]  ;;  %v428_v10 = vld [vmem:[#allocation2] sm:$0xff]  ;;  %v190_v13 = vand.u32 127, %v189_v12  ;;  %s179_s9 = sand.u32 1, %s582_s13   ;;  %s436_s19 = sshll.u32 %s640_s16, 4 }
  0x19   : > { %s730_s4 = smov (!%p183_p13, %s385_s4), 3  ;;  %s384_s10 = sshll.u32 %s179_s9, 4  ;;  %v222_v16 = vld [vmem:[%s720_s1] sm:$0xff]  ;;  %v223_v19 = vld [vmem:[%s720_s1 + $0x8] sm:$0xff] }
  0x1a   : > { %s386_s5 = sshll.u32 %s730_s4, 3  ;;  %s300_s25 = scalar_lea.hbm %s722_s3, %s436_s19 }
  0x1b   : > { %s186_s8 = scalar_lea.vmem %s719_s0, %s386_s5  ;;  %273 = vmatpush.bf16.msra.mxu0 %v434_v3  ;;  %s181_s26 = scalar_lea.vmem [#allocation5], %s384_s10 }
  0x1c   : > { %v191_v1 = vld [vmem:[%s186_s8] sm:$0xff]  ;;  %v192_v4 = vld [vmem:[%s186_s8 + $0x8] sm:$0xff]  ;;  %s301_s27 = sshll.u32 %s181_s26, 4  ;;  %s303_s28 = sshll.u32 %s300_s25, 4  ;;  %s302_s27 = int_to_ptr.vmem [resolvable:$true] %s301_s27  ;;  %s304_s28 = int_to_ptr.hbm [resolvable:$true] %s303_s28 }
  0x1d   : > { %194 = vperm.xlu0 %493, %v191_v1   ;;  %s289_s16 = scalar_lea.sflag [#allocation4], %s179_s9  ;;  %s538_s4 = sshra.s32 %s304_s28, 4  ;;  %s539_s4 = int_to_ptr.hbm [resolvable:$true] %s538_s4 }
  0x1e   : > { %s540_s5 = scalar_lea.hbm %s539_s4, 16  ;;  %s544_s8 = scalar_lea.hbm %s722_s3, 32 }
  0x1f   : > { %274 = vmatpush.bf16.msra.mxu0 %v433_v5  ;;  %p541_p0 = scmp.ne.s32.totalorder %s539_s4, %s540_s5  ;;  %p545_p3 = scmp.lt.s32.totalorder %s539_s4, %s722_s3 }
  0x20   : > { %p546_p4 = scmp.lt.s32.totalorder %s544_s8, %s540_s5 }
  0x21   : > { %p542_p1 = pnand %p541_p0, %p657_p5 }
  0x22   : > { %p547_p7 = por %p546_p4, %p545_p3 }
  0x23   : > { %275 = vmatpush.bf16.msra.mxu0 %v432_v6  ;;  %p543_p2 = pneg %p542_p1 }
  0x25   : > { %197 = vperm.xlu0 %493, %v192_v4   ;;  %p548_p8 = pnand %p547_p7, %p543_p2 }
  0x27   : > { %276 = vmatpush.bf16.msra.mxu0 %v431_v7 }
  0x2b   : > { %277 = vmatpush.bf16.msra.mxu0 %v430_v8 }
  0x2f   : > { %278 = vmatpush.bf16.msra.mxu0 %v429_v9 }
  0x33   : > { %279 = vmatpush.bf16.msra.mxu0 %v428_v10 }
  0x8f   : > { %v195_v11 = vpop.permute.xlu0 %194 }
  0x90   : > { %vm199_vm0 = vcmp.eq.s32.totalorder %v190_v13, %v195_v11 }
  0x97   : > { %v198_v14 = vpop.permute.xlu0 %197 }
  0x98   : > { %vm200_vm1 = vcmp.eq.s32.totalorder %v190_v13, %v198_v14 }
  0x99   : > { %vm421_vm2 = vmpackc.low %vm200_vm1, %vm199_vm0 }
  0x9a   : > { %422 = vmatmul.msk.bf16.vlgmr.msra.gmra.mxu0 %vm421_vm2, %v596_v15 }
 0x117   : > { %v281_v17 = vpop.f32.mrf.mxu0 }
 0x118   : > { %v282_v18 = vadd.f32 %v281_v17, %v222_v16 }
 0x11a   : > { %286 = vst [vmem:[%s181_s26] sm:$0xff] %v282_v18 }
 0x11f   : > { %v283_v20 = vpop.f32.mrf.mxu0 }
 0x120   : > { %v284_v21 = vadd.f32 %v283_v20, %v223_v19 }
 0x122   : > { %287 = vst [vmem:[%s181_s26 + $0x8] sm:$0xff] %v284_v21 }
 0x123   : > { %551 = shalt.err (!%p548_p8)
}
 0x124   : > { %s597_s9 = smov 128   ;;  %s598_s17 = smov 8  }
 0x125   : > { %441 = dma.vmem_to_hbm [thread:$0]  (%p657_p5), %s302_s27, 256, %s304_s28, %s289_s16, %s597_s9, %s597_s9, %s598_s17  }
 0x126 PF: > { %p453_p9 = scmp.ge.s32.totalorder %s590_s15, 2  ;;  %s318_s19 = sand.u32 1, %s578_s12  }
 0x127   : > { %s319_s20 = scalar_lea.sflag [#allocation4], %s318_s19 }
 0x128   : > { %p448_p10 = pnand %p453_p9, %p661_p6 }
 0x12a   : > { %p449_p11 = pneg %p448_p10 }
 0x12c   : > { %573 = dma.done.wait (%p449_p11), %s319_s20, 256  }
 0x12d   : > { %575 = vsyncadd (%p449_p11), %s319_s20, 4294967040  ;;  %p14_p12 = scmp.ge.s32.totalorder %s644_s18, 4   ;;  %s725_s12 = smov %s582_s13 }
 0x12e   : > { %s726_s13 = smov %s586_s14  ;;  %s727_s14 = smov %s655_s21 }
 0x12f   : > { %s728_s15 = smov %s644_s18  ;;  %16 = sbr.rel (!%p14_p12) target bundleno = 4 (0x4), region = 72 }
 0x134   :  { %325 = vsyncpa [#allocation3], 1 }
 0x135   :  { %327 = vsyncpa [#allocation3 + $0x1], 1 }
 0x136   :  { %328 = vsyncpa [#allocation4], 1 }
 0x137   :  { %330 = vsyncpa [#allocation4 + $0x1], 1 }

// kernel: tpu_custom_call.1
= control target key start
LH: loop header
LB: loop body
LE: loop exit
PB: predicated region body
PF: predicated region fallthrough
CT: control target
= control target key end

     0   :  { %8 = vsyncpa [#allocation3], 0  ;;  %s719_s0 = inlined_call_operand.vmem [shape: s32[32,1], index: 0, kind: input, shape index: {}]   ;;  %s720_s1 = inlined_call_operand.vmem [shape: f32[16,128], index: 1, kind: input, shape index: {}]   ;;  %s721_s2 = inlined_call_operand.hbm [shape: bf16[128,128], index: 2, kind: input, shape index: {}]   ;;  %s722_s3 = inlined_call_operand.hbm [shape: f32[32,128], index: 3, kind: output, shape index: {}]  }
   0x1   :  { %9 = vsyncpa [#allocation4], 0 }
   0x2   :  { %11 = vsyncpa [#allocation4 + $0x1], 0  ;;  %s619_s12 = smov 0   ;;  %s621_s13 = smov 0  }
   0x3   :  { %s623_s14 = smov 0   ;;  %s625_s15 = smov 0  }
   0x4 LB: > { %s640_s16 = sadd.s32 4294967295, %s590_s15   ;;  %s378_s17 = sadd.s32 4294967294, %s590_s15   ;;  %s590_s15 = sphi %s625_s15, %s728_s15   ;;  %s586_s14 = sphi %s623_s14, %s727_s14   ;;  %s582_s13 = sphi %s621_s13, %s726_s13   ;;  %s578_s12 = sphi %s619_s12, %s725_s12  }
   0x5   : > { %s644_s18 = sadd.s32 1, %s590_s15   ;;  %s92_s19 = sadd.s32 1, %s586_s14 }
   0x6   : > { %s89_s20 = ssub.s32 %s590_s15, %s644_s18  ;;  %p102_p0 = scmp.ne.s32.totalorder %s586_s14, %s582_s13 }
   0x7   : > { %p90_p1 = scmp.eq.s32.totalorder %s89_s20, 0  ;;  %p103_p2 = scmp.eq.s32.totalorder %s640_s16, 1 }
   0x8   : > { %p108_p3 = scmp.ne.s32.totalorder %s582_s13, %s578_s12  ;;  %p109_p4 = scmp.eq.s32.totalorder %s378_s17, 1 }
   0x9   : > { %s655_s21 = scalar_select %p90_p1, %s586_s14, %s92_s19  }
   0xa   : > { %p657_p5 = por %p103_p2, %p102_p0  ;;  %p661_p6 = por %p109_p4, %p108_p3 }
   0xb   : > { %p379_p7 = scmp.ge.s32.totalorder %s590_s15, 1  ;;  %p116_p8 = scmp.lt.s32.totalorder %s590_s15, 3 }
   0xc   : > { %p451_p9 = scmp.eq.s32.totalorder %s640_s16, 0  ;;  %s130_s26 = sshll.u32 %s721_s2, 4  ;;  %s131_s26 = int_to_ptr.hbm [resolvable:$true] %s130_s26 }
   0xd   : > { %p117_p10 = pnand %p379_p7, %p116_p8  ;;  %s592_s27 = smov [#allocation2]  }
   0xe   : > { %s132_s28 = sshll.u32 %s592_s27, 4  ;;  %s593_s29 = smov 64   ;;  %s133_s28 = int_to_ptr.vmem [resolvable:$true] %s132_s28 }
   0xf   : > { %p443_p11 = pneg %p117_p10  ;;  %s594_s30 = smov 4  }
  0x10   : > { %157 = sbr.rel (%p117_p10) target bundleno = 294 (0x126), region = 32 }
  0x11   : > { %p444_p12 = pnand %p451_p9, %p443_p11 }
  0x13   : > { %446 = dma.hbm_to_vmem [thread:$0]  (!%p444_p12), %s131_s26, 1024, %s133_s28, [#allocation3], %s593_s29, %s593_s29, %s594_s30  }
  0x15   : > { %569 = dma.done.wait (%p451_p9), [#allocation3], 1024  }
  0x16   : > { %571 = vsyncadd (%p451_p9), [#allocation3], 4294966272  ;;  %s385_s4 = sshll.u32 %s640_s16, 1  ;;  %v595_v0 = vmov 0   ;;  %v435_v2 = vld [vmem:[#allocation2 + $0x38] sm:$0xff]  ;;  %v434_v3 = vld [vmem:[#allocation2 + $0x30] sm:$0xff]  ;;  %v189_v12 = vlaneseq }
  0x17   : > { %493 = vset.pattern.permute.xlu0 %v595_v0  ;;  %p183_p13 = scmp.lt.s32.totalorder %s385_s4, 3  ;;  %272 = vmatpush.bf16.msra.mxu0 %v435_v2  ;;  %v433_v5 = vld [vmem:[#allocation2 + $0x28] sm:$0xff]  ;;  %v432_v6 = vld [vmem:[#allocation2 + $0x20] sm:$0xff]  ;;  %v431_v7 = vld [vmem:[#allocation2 + $0x18] sm:$0xff]  ;;  %v596_v15 = vmov 1.0|1.0  }
  0x18   : > { %v430_v8 = vld [vmem:[#allocation2 + $0x10] sm:$0xff]  ;;  %v429_v9 = vld [vmem:[#allocation2 + $0x8] sm:$0xff]  ;;  %v428_v10 = vld [vmem:[#allocation2] sm:$0xff]  ;;  %v190_v13 = vand.u32 127, %v189_v12  ;;  %s179_s9 = sand.u32 1, %s582_s13   ;;  %s436_s19 = sshll.u32 %s640_s16, 4 }
  0x19   : > { %s730_s4 = smov (!%p183_p13, %s385_s4), 3  ;;  %s384_s10 = sshll.u32 %s179_s9, 4  ;;  %v222_v16 = vld [vmem:[%s720_s1] sm:$0xff]  ;;  %v223_v19 = vld [vmem:[%s720_s1 + $0x8] sm:$0xff] }
  0x1a   : > { %s386_s5 = sshll.u32 %s730_s4, 3  ;;  %s300_s25 = scalar_lea.hbm %s722_s3, %s436_s19 }
  0x1b   : > { %s186_s8 = scalar_lea.vmem %s719_s0, %s386_s5  ;;  %273 = vmatpush.bf16.msra.mxu0 %v434_v3  ;;  %s181_s26 = scalar_lea.vmem [#allocation5], %s384_s10 }
  0x1c   : > { %v191_v1 = vld [vmem:[%s186_s8] sm:$0xff]  ;;  %v192_v4 = vld [vmem:[%s186_s8 + $0x8] sm:$0xff]  ;;  %s301_s27 = sshll.u32 %s181_s26, 4  ;;  %s303_s28 = sshll.u32 %s300_s25, 4  ;;  %s302_s27 = int_to_ptr.vmem [resolvable:$true] %s301_s27  ;;  %s304_s28 = int_to_ptr.hbm [resolvable:$true] %s303_s28 }
  0x1d   : > { %194 = vperm.xlu0 %493, %v191_v1   ;;  %s289_s16 = scalar_lea.sflag [#allocation4], %s179_s9  ;;  %s538_s4 = sshra.s32 %s304_s28, 4  ;;  %s539_s4 = int_to_ptr.hbm [resolvable:$true] %s538_s4 }
  0x1e   : > { %s540_s5 = scalar_lea.hbm %s539_s4, 16  ;;  %s544_s8 = scalar_lea.hbm %s722_s3, 32 }
  0x1f   : > { %274 = vmatpush.bf16.msra.mxu0 %v433_v5  ;;  %p541_p0 = scmp.ne.s32.totalorder %s539_s4, %s540_s5  ;;  %p545_p3 = scmp.lt.s32.totalorder %s539_s4, %s722_s3 }
  0x20   : > { %p546_p4 = scmp.lt.s32.totalorder %s544_s8, %s540_s5 }
  0x21   : > { %p542_p1 = pnand %p541_p0, %p657_p5 }
  0x22   : > { %p547_p7 = por %p546_p4, %p545_p3 }
  0x23   : > { %275 = vmatpush.bf16.msra.mxu0 %v432_v6  ;;  %p543_p2 = pneg %p542_p1 }
  0x25   : > { %197 = vperm.xlu0 %493, %v192_v4   ;;  %p548_p8 = pnand %p547_p7, %p543_p2 }
  0x27   : > { %276 = vmatpush.bf16.msra.mxu0 %v431_v7 }
  0x2b   : > { %277 = vmatpush.bf16.msra.mxu0 %v430_v8 }
  0x2f   : > { %278 = vmatpush.bf16.msra.mxu0 %v429_v9 }
  0x33   : > { %279 = vmatpush.bf16.msra.mxu0 %v428_v10 }
  0x8f   : > { %v195_v11 = vpop.permute.xlu0 %194 }
  0x90   : > { %vm199_vm0 = vcmp.eq.s32.totalorder %v190_v13, %v195_v11 }
  0x97   : > { %v198_v14 = vpop.permute.xlu0 %197 }
  0x98   : > { %vm200_vm1 = vcmp.eq.s32.totalorder %v190_v13, %v198_v14 }
  0x99   : > { %vm421_vm2 = vmpackc.low %vm200_vm1, %vm199_vm0 }
  0x9a   : > { %422 = vmatmul.msk.bf16.vlgmr.msra.gmra.mxu0 %vm421_vm2, %v596_v15 }
 0x117   : > { %v281_v17 = vpop.f32.mrf.mxu0 }
 0x118   : > { %v282_v18 = vadd.f32 %v281_v17, %v222_v16 }
 0x11a   : > { %286 = vst [vmem:[%s181_s26] sm:$0xff] %v282_v18 }
 0x11f   : > { %v283_v20 = vpop.f32.mrf.mxu0 }
 0x120   : > { %v284_v21 = vadd.f32 %v283_v20, %v223_v19 }
 0x122   : > { %287 = vst [vmem:[%s181_s26 + $0x8] sm:$0xff] %v284_v21 }
 0x123   : > { %551 = shalt.err (!%p548_p8)
}
 0x124   : > { %s597_s9 = smov 128   ;;  %s598_s17 = smov 8  }
 0x125   : > { %441 = dma.vmem_to_hbm [thread:$0]  (%p657_p5), %s302_s27, 256, %s304_s28, %s289_s16, %s597_s9, %s597_s9, %s598_s17  }
 0x126 PF: > { %p453_p9 = scmp.ge.s32.totalorder %s590_s15, 2  ;;  %s318_s19 = sand.u32 1, %s578_s12  }
 0x127   : > { %s319_s20 = scalar_lea.sflag [#allocation4], %s318_s19 }
 0x128   : > { %p448_p10 = pnand %p453_p9, %p661_p6 }
 0x12a   : > { %p449_p11 = pneg %p448_p10 }
 0x12c   : > { %573 = dma.done.wait (%p449_p11), %s319_s20, 256  }
 0x12d   : > { %575 = vsyncadd (%p449_p11), %s319_s20, 4294967040  ;;  %p14_p12 = scmp.ge.s32.totalorder %s644_s18, 4   ;;  %s725_s12 = smov %s582_s13 }
 0x12e   : > { %s726_s13 = smov %s586_s14  ;;  %s727_s14 = smov %s655_s21 }
 0x12f   : > { %s728_s15 = smov %s644_s18  ;;  %16 = sbr.rel (!%p14_p12) target bundleno = 4 (0x4), region = 72 }
 0x134   :  { %325 = vsyncpa [#allocation3], 1 }
 0x135   :  { %327 = vsyncpa [#allocation3 + $0x1], 1 }
 0x136   :  { %328 = vsyncpa [#allocation4], 1 }
 0x137   :  { %330 = vsyncpa [#allocation4 + $0x1], 1 }

</bundles_post_ra>
